<compile_context>
chip_gen: v7x
topology: tpu7x:2x2x1
jax: 0.10.0
libtpu: 0.0.40
codegen_flags: <defaults>
</compile_context>

<pallas_src>
import functools

import jax
import jax.numpy as jnp
from jax.experimental import pallas as pl
from jax.experimental.pallas import tpu as pltpu

BN_EPS = 1e-5
H1, H2, H3 = 32, 32, 16      # hidden widths of the head MLP
P_W = 32                     # lane width of the packed small-parameter slab


def _round_up(x, m):
    return ((x + m - 1) // m) * m


def _head_kernel(x_ref, w1t_ref, p_ref, out_ref, *,
                 out_dim, w4_r0, b_r0, b4_r0, apply_sigmoid):
    """One batch tile of the fused (BN-folded) 4-layer MLP head.

    x_ref  : (TILE_N, d_in)    activations (BN already folded into fc_1)
    w1t_ref: (H1, d_in)        BN-folded fc_1 weight, transposed, x dtype
    p_ref  : (P_ROWS, P_W)     packed small params [w2; w3; w4^T; b1..b3; b4 col]
    out_ref: (out_dim, TILE_N) transposed, lane-dense output
    """
    x = x_ref[...]                                    # (T, d_in), f32 or bf16
    w1t = w1t_ref[...]                                # (H1, d_in), same dtype

    w2 = p_ref[0:H1, 0:H2]                            # (32, 32)
    w3 = p_ref[H1:H1 + H2, 0:H3]                      # (32, 16)
    w4t = p_ref[w4_r0:w4_r0 + out_dim, 0:H3]          # (out_dim, 16)
    b1 = p_ref[b_r0:b_r0 + 1, 0:H1]                   # (1, 32)
    b2 = p_ref[b_r0 + 1:b_r0 + 2, 0:H2]               # (1, 32)
    b3 = p_ref[b_r0 + 2:b_r0 + 3, 0:H3]               # (1, 16)
    b4c = p_ref[b4_r0:b4_r0 + out_dim, 0:1]           # (out_dim, 1)

    # fc1 with BN folded; weight shipped transposed -> trans-B matmul.
    h = jax.lax.dot_general(x, w1t, (((1,), (1,)), ((), ())),
                            preferred_element_type=jnp.float32)
    h = jnp.maximum(h + b1, 0.0)
    h = jnp.maximum(jnp.dot(h, w2, preferred_element_type=jnp.float32) + b2, 0.0)
    h = jnp.maximum(jnp.dot(h, w3, preferred_element_type=jnp.float32) + b3, 0.0)

    # Final layer computed transposed: y^T = w4^T @ h^T  (trans-B dot_general).
    yt = jax.lax.dot_general(w4t, h, (((1,), (1,)), ((), ())),
                             preferred_element_type=jnp.float32) + b4c

    if apply_sigmoid:                                  # outNum == 1 path
        e = jnp.exp(-jnp.abs(yt))                      # EUP; stable for |y| large
        yt = jnp.where(yt >= 0.0, 1.0 / (1.0 + e), e / (1.0 + e))

    out_ref[...] = yt.astype(out_ref.dtype)


def model_forward(x, params, *, tile_n=None, apply_sigmoid=None, x_dtype=None,
                  vmem_budget_bytes=None):
    """Forward pass of the classification head on backbone feature vectors.

    params: gamma/beta (1, d_in); w1..w4 as (in, out); b1..b4 as (1, out).
    BatchNorm1d is evaluated in training mode (full-batch stats, biased
    variance, eps=1e-5), computed in one fused pass and folded into fc_1
    OUTSIDE the kernel, so the kernel has no cross-batch reduction and the
    batch grid axis is parallel.
    """
    n, d_in = x.shape
    out_dim = params["w4"].shape[1]
    if apply_sigmoid is None:
        apply_sigmoid = (out_dim == 1)                 # mirrors `if self.outNum == 1`

    # x transfer dtype: bf16 by default for backbone-sized features (halves the
    # dominant HBM read); keep the input dtype otherwise (exact parity).
    if x_dtype is None:
        x_dtype = jnp.bfloat16 if (d_in >= 512 and x.dtype == jnp.float32) else x.dtype
    x_dtype = jnp.dtype(x_dtype)

    # ---- BatchNorm1d (train mode), single fused pass (E[x^2] - E[x]^2).
    xf = x.astype(jnp.float32)                         # fused into the reductions
    s = jnp.sum(xf, axis=0, keepdims=True)
    ss = jnp.sum(xf * xf, axis=0, keepdims=True)
    mean = s / n
    var = jnp.maximum(ss / n - mean * mean, 0.0)       # biased variance
    scale = params["gamma"] * jax.lax.rsqrt(var + BN_EPS)     # (1, d_in)
    shift = params["beta"] - mean * scale                      # (1, d_in)
    w1t = (params["w1"] * scale.reshape(-1, 1)).T.astype(x_dtype)   # (H1, d_in)
    b1f = params["b1"] + jnp.dot(shift, params["w1"],
                                 precision=jax.lax.Precision.HIGHEST)

    # ---- Pack the small parameters into one 32-lane slab (w1 stays separate).
    w4_r0 = H1 + H2
    b_r0 = w4_r0 + _round_up(out_dim, 8)
    b4_r0 = b_r0 + 8
    p_rows = _round_up(b4_r0 + out_dim, 8)
    p = jnp.zeros((p_rows, P_W), jnp.float32)
    p = p.at[0:H1, 0:H2].set(params["w2"])
    p = p.at[H1:H1 + H2, 0:H3].set(params["w3"])
    p = p.at[w4_r0:w4_r0 + out_dim, 0:H3].set(params["w4"].T)
    p = p.at[b_r0, 0:H1].set(b1f.reshape(-1))
    p = p.at[b_r0 + 1, 0:H2].set(params["b2"].reshape(-1))
    p = p.at[b_r0 + 2, 0:H3].set(params["b3"].reshape(-1))
    p = p.at[b4_r0:b4_r0 + out_dim, 0].set(params["b4"].reshape(-1))

    # ---- Generation-aware tile sizing from the VMEM budget.
    granule = 16                                       # legal for f32 and bf16 blocks
    if vmem_budget_bytes is None:
        try:
            vmem_budget_bytes = int(pltpu.get_tpu_info().vmem_capacity_bytes)
        except Exception:
            vmem_budget_bytes = 64 * 1024 * 1024       # v7x-safe fallback
    x_item = x_dtype.itemsize
    lane = lambda v: _round_up(v, 128)
    x_row_vmem = lane(d_in) * x_item                   # x tile, lane-padded
    out_row_vmem = _round_up(out_dim, 8) * 4           # y^T tile, sublane-padded
    work_row = 3 * H1 * 4                              # live f32 intermediates
    resident = 2 * (H1 * lane(d_in) * x_item + p_rows * lane(P_W) * 4)
    per_row = 2 * (x_row_vmem + out_row_vmem) + work_row   # double-buffered
    budget = max(int(vmem_budget_bytes * 0.4) - resident, granule * per_row)
    tile_cap = min(32768, (budget // per_row) // granule * granule)
    tile_cap = max(granule, tile_cap)
    if tile_n is not None:
        tile_cap = max(granule, min(tile_cap, _round_up(tile_n, granule)))

    n_g = _round_up(n, granule)
    tile = min(tile_cap, n_g)                          # single-tile fast path
    # If the whole batch fits one step but there is real work, split in two so
    # the "parallel" axis spans both v7x TensorCores.
    if tile == n_g and n_g >= 2 * granule and n_g * d_in * x_item > (2 << 20):
        tile = _round_up((n_g + 1) // 2, granule)
    n_pad = _round_up(n, tile)

    vmem_limit = int(min(max(per_row * tile + resident + (4 << 20), 32 << 20),
                         int(vmem_budget_bytes * 0.9)))

    xk = x.astype(x_dtype)
    if n_pad != n:
        xk = jnp.pad(xk, ((0, n_pad - n), (0, 0)))

    kernel = functools.partial(_head_kernel, out_dim=out_dim, w4_r0=w4_r0,
                               b_r0=b_r0, b4_r0=b4_r0,
                               apply_sigmoid=bool(apply_sigmoid))

    yt = pl.pallas_call(
        kernel,
        out_shape=jax.ShapeDtypeStruct((out_dim, n_pad), jnp.float32),
        grid=(n_pad // tile,),
        in_specs=[
            pl.BlockSpec((tile, d_in), lambda i: (i, 0)),       # streamed
            pl.BlockSpec((H1, d_in), lambda i: (0, 0)),         # VMEM-resident
            pl.BlockSpec((p_rows, P_W), lambda i: (0, 0)),      # VMEM-resident
        ],
        out_specs=pl.BlockSpec((out_dim, tile), lambda i: (0, i)),
        compiler_params=pltpu.CompilerParams(
            dimension_semantics=("parallel",),
            vmem_limit_bytes=vmem_limit,
        ),
    )(xk, w1t, p)

    if out_dim == 1:
        return yt[0, :n]                               # torch.squeeze on (N,1) -> (N,)
    return yt[:, :n].T                                 # (N, out_dim)


def _reference_forward(x, params, apply_sigmoid):
    """Pure-JAX reference (HIGHEST-precision matmuls) for correctness check."""
    hp = jax.lax.Precision.HIGHEST
    x = x.astype(jnp.float32)
    mean = jnp.mean(x, axis=0, keepdims=True)
    var = jnp.mean((x - mean) ** 2, axis=0, keepdims=True)
    xb = (x - mean) * jax.lax.rsqrt(var + BN_EPS) * params["gamma"] + params["beta"]
    h = jax.nn.relu(jnp.dot(xb, params["w1"], precision=hp) + params["b1"])
    h = jax.nn.relu(jnp.dot(h, params["w2"], precision=hp) + params["b2"])
    h = jax.nn.relu(jnp.dot(h, params["w3"], precision=hp) + params["b3"])
    y = jnp.dot(h, params["w4"], precision=hp) + params["b4"]
    if apply_sigmoid:
        y = jax.nn.sigmoid(y)
    if y.shape[1] == 1:
        y = jnp.squeeze(y, axis=1)
    return y


def init_params(key, input_dim, output_dim):
    """Deterministic parameter init (synthetic; not a checkpoint load)."""
    dims = [(input_dim, H1), (H1, H2), (H2, H3), (H3, output_dim)]
    keys = jax.random.split(key, 2 * len(dims))
    params = {
        "gamma": jnp.ones((1, input_dim), jnp.float32),
        "beta": jnp.zeros((1, input_dim), jnp.float32),
    }
    for i, (fan_in, fan_out) in enumerate(dims):
        bound = 1.0 / (fan_in ** 0.5)  # same range as PyTorch Linear default
        params[f"w{i + 1}"] = jax.random.uniform(
            keys[2 * i], (fan_in, fan_out), jnp.float32, -bound, bound)
        params[f"b{i + 1}"] = jax.random.uniform(
            keys[2 * i + 1], (1, fan_out), jnp.float32, -bound, bound)
    return params


if __name__ == "__main__":
    key = jax.random.PRNGKey(0)
    k_x, k_p = jax.random.split(key)

    batch, input_dim, output_dim = 256, 16, 1
    x = jax.random.normal(k_x, (batch, input_dim), jnp.float32)
    params = init_params(k_p, input_dim, output_dim)

    out = model_forward(x, params)
    jax.block_until_ready(out)
    assert out.shape == (batch,), out.shape

    ref = _reference_forward(x, params, apply_sigmoid=True)
    err = float(jnp.max(jnp.abs(out - ref)))
    assert err < 1e-2, f"max abs err {err}"

    print("KERNEL_OK")
</pallas_src>

<mosaic_0001>
module attributes {stable_mosaic.version = 11 : i64} {
  func.func @_head_kernel(%arg0: i32, %arg1: memref<256x16xf32, #tpu.memory_space<vmem>>, %arg2: memref<32x16xf32, #tpu.memory_space<vmem>>, %arg3: memref<88x32xf32, #tpu.memory_space<vmem>>, %arg4: memref<1x256xf32, #tpu.memory_space<vmem>>) attributes {dimension_semantics = [#tpu.dimension_semantics<parallel>], iteration_bounds = array<i64: 1>, scalar_prefetch = 0 : i64, scratch_operands = 0 : i64, tpu.core_type = #tpu.core_type<tc>, window_params = [{transform_indices = @transform_0, window_bounds = array<i64: 256, 16>}, {pipeline_mode = #tpu.pipeline_mode<synchronous>, transform_indices = @transform_1, window_bounds = array<i64: 32, 16>}, {pipeline_mode = #tpu.pipeline_mode<synchronous>, transform_indices = @transform_2, window_bounds = array<i64: 88, 32>}, {transform_indices = @transform_3, window_bounds = array<i64: 1, 256>}]} {
    %c0 = arith.constant 0 : index
    %c0_0 = arith.constant 0 : index
    %0 = vector.load %arg1[%c0, %c0_0] : memref<256x16xf32, #tpu.memory_space<vmem>>, vector<256x16xf32>
    %c0_1 = arith.constant 0 : index
    %c0_2 = arith.constant 0 : index
    %1 = vector.load %arg2[%c0_1, %c0_2] : memref<32x16xf32, #tpu.memory_space<vmem>>, vector<32x16xf32>
    %c0_3 = arith.constant 0 : index
    %c0_4 = arith.constant 0 : index
    %2 = vector.load %arg3[%c0_3, %c0_4] : memref<88x32xf32, #tpu.memory_space<vmem>>, vector<32x32xf32>
    %c32 = arith.constant 32 : index
    %c0_5 = arith.constant 0 : index
    %3 = vector.load %arg3[%c32, %c0_5] : memref<88x32xf32, #tpu.memory_space<vmem>>, vector<32x16xf32>
    %c64 = arith.constant 64 : index
    %c0_6 = arith.constant 0 : index
    %4 = vector.load %arg3[%c64, %c0_6] : memref<88x32xf32, #tpu.memory_space<vmem>>, vector<1x16xf32>
    %c72 = arith.constant 72 : index
    %c0_7 = arith.constant 0 : index
    %5 = vector.load %arg3[%c72, %c0_7] : memref<88x32xf32, #tpu.memory_space<vmem>>, vector<1x32xf32>
    %c73 = arith.constant 73 : index
    %c0_8 = arith.constant 0 : index
    %6 = vector.load %arg3[%c73, %c0_8] : memref<88x32xf32, #tpu.memory_space<vmem>>, vector<1x32xf32>
    %c74 = arith.constant 74 : index
    %c0_9 = arith.constant 0 : index
    %7 = vector.load %arg3[%c74, %c0_9] : memref<88x32xf32, #tpu.memory_space<vmem>>, vector<1x16xf32>
    %c80 = arith.constant 80 : index
    %c0_10 = arith.constant 0 : index
    %8 = vector.load %arg3[%c80, %c0_10] : memref<88x32xf32, #tpu.memory_space<vmem>>, vector<1x1xf32>
    %cst = arith.constant dense<0.000000e+00> : vector<256x32xf32>
    %9 = tpu.matmul %0, %1, %cst {dimension_numbers = #tpu.dot_dimension_numbers<[1], [1], [0], [0], [0, 0, 1, 0], [], []>} : vector<256x16xf32>, vector<32x16xf32>, vector<256x32xf32> -> vector<256x32xf32>
    %10 = vector.broadcast %5 : vector<1x32xf32> to vector<256x32xf32>
    %11 = arith.addf %9, %10 : vector<256x32xf32>
    %cst_11 = arith.constant 0.000000e+00 : f32
    %12 = vector.broadcast %cst_11 : f32 to vector<256x32xf32>
    %13 = arith.maximumf %11, %12 : vector<256x32xf32>
    %cst_12 = arith.constant dense<0.000000e+00> : vector<256x32xf32>
    %14 = tpu.matmul %13, %2, %cst_12 {dimension_numbers = #tpu.dot_dimension_numbers<[1], [0], [0], [1], [0, 0, 1, 1], [], []>} : vector<256x32xf32>, vector<32x32xf32>, vector<256x32xf32> -> vector<256x32xf32>
    %15 = vector.broadcast %6 : vector<1x32xf32> to vector<256x32xf32>
    %16 = arith.addf %14, %15 : vector<256x32xf32>
    %cst_13 = arith.constant 0.000000e+00 : f32
    %17 = vector.broadcast %cst_13 : f32 to vector<256x32xf32>
    %18 = arith.maximumf %16, %17 : vector<256x32xf32>
    %cst_14 = arith.constant dense<0.000000e+00> : vector<256x16xf32>
    %19 = tpu.matmul %18, %3, %cst_14 {dimension_numbers = #tpu.dot_dimension_numbers<[1], [0], [0], [1], [0, 0, 1, 1], [], []>} : vector<256x32xf32>, vector<32x16xf32>, vector<256x16xf32> -> vector<256x16xf32>
    %20 = vector.broadcast %7 : vector<1x16xf32> to vector<256x16xf32>
    %21 = arith.addf %19, %20 : vector<256x16xf32>
    %cst_15 = arith.constant 0.000000e+00 : f32
    %22 = vector.broadcast %cst_15 : f32 to vector<256x16xf32>
    %23 = arith.maximumf %21, %22 : vector<256x16xf32>
    %cst_16 = arith.constant dense<0.000000e+00> : vector<1x256xf32>
    %24 = tpu.matmul %4, %23, %cst_16 {dimension_numbers = #tpu.dot_dimension_numbers<[1], [1], [0], [0], [0, 0, 1, 0], [], []>} : vector<1x16xf32>, vector<256x16xf32>, vector<1x256xf32> -> vector<1x256xf32>
    %25 = vector.broadcast %8 : vector<1x1xf32> to vector<1x256xf32>
    %26 = arith.addf %24, %25 : vector<1x256xf32>
    %27 = math.absf %26 : vector<1x256xf32>
    %cst_17 = arith.constant 0.000000e+00 : f32
    %28 = vector.broadcast %cst_17 : f32 to vector<1x256xf32>
    %29 = arith.subf %28, %27 : vector<1x256xf32>
    %30 = math.exp %29 : vector<1x256xf32>
    %cst_18 = arith.constant 0.000000e+00 : f32
    %31 = vector.broadcast %cst_18 : f32 to vector<1x256xf32>
    %32 = arith.cmpf oge, %26, %31 : vector<1x256xf32>
    %cst_19 = arith.constant 1.000000e+00 : f32
    %33 = vector.broadcast %cst_19 : f32 to vector<1x256xf32>
    %34 = arith.addf %33, %30 : vector<1x256xf32>
    %cst_20 = arith.constant 1.000000e+00 : f32
    %35 = vector.broadcast %cst_20 : f32 to vector<1x256xf32>
    %36 = arith.divf %35, %34 : vector<1x256xf32>
    %cst_21 = arith.constant 1.000000e+00 : f32
    %37 = vector.broadcast %cst_21 : f32 to vector<1x256xf32>
    %38 = arith.addf %37, %30 : vector<1x256xf32>
    %39 = arith.divf %30, %38 : vector<1x256xf32>
    %40 = arith.select %32, %36, %39 : vector<1x256xi1>, vector<1x256xf32>
    %c0_22 = arith.constant 0 : index
    %c0_23 = arith.constant 0 : index
    %41 = vector.load %arg4[%c0_22, %c0_23] : memref<1x256xf32, #tpu.memory_space<vmem>>, vector<1x256xf32>
    tpu.vector_store %arg4[%c0_22, %c0_23], %40 {strides = array<i32>} : memref<1x256xf32, #tpu.memory_space<vmem>>, vector<1x256xf32>,
    return
  }
  func.func @transform_0(%arg0: i32) -> (i32, i32) {
    %c0_i32 = arith.constant 0 : i32
    %c0_i32_0 = arith.constant 0 : i32
    return %arg0, %c0_i32 : i32, i32
  }
  func.func @transform_1(%arg0: i32) -> (i32, i32) {
    %c0_i32 = arith.constant 0 : i32
    %c0_i32_0 = arith.constant 0 : i32
    %c0_i32_1 = arith.constant 0 : i32
    return %c0_i32, %c0_i32_0 : i32, i32
  }
  func.func @transform_2(%arg0: i32) -> (i32, i32) {
    %c0_i32 = arith.constant 0 : i32
    %c0_i32_0 = arith.constant 0 : i32
    %c0_i32_1 = arith.constant 0 : i32
    return %c0_i32, %c0_i32_0 : i32, i32
  }
  func.func @transform_3(%arg0: i32) -> (i32, i32) {
    %c0_i32 = arith.constant 0 : i32
    %c0_i32_0 = arith.constant 0 : i32
    return %c0_i32, %arg0 : i32, i32
  }
}

</mosaic_0001>

<bundles_post_ra>
// kernel: tpu_custom_call.1
= control target key start
LH: loop header
LB: loop body
LE: loop exit
PB: predicated region body
PF: predicated region fallthrough
CT: control target
= control target key end

     0   :  { %vm68_vm0 = vcmask 130048   ;;  %s2392_s0 = inlined_call_operand.vmem [shape: f32[256,16], index: 0, kind: input, shape index: {}]   ;;  %s2393_s1 = inlined_call_operand.vmem [shape: f32[32,16], index: 1, kind: input, shape index: {}]   ;;  %s2394_s2 = inlined_call_operand.vmem [shape: f32[88,32], index: 2, kind: input, shape index: {}]   ;;  %s2395_s3 = inlined_call_operand.hbm [shape: f32[1,256], index: 3, kind: output, shape index: {}]  }
   0x1   :  { %v47_v0 = vld [vmem:[%s2393_s1] sm:$0xff]  ;;  %v48_v1 = vld [vmem:[%s2393_s1 + $0x8] sm:$0xff]  ;;  %v49_v2 = vld [vmem:[%s2393_s1 + $0x10] sm:$0xff] }
   0x2   :  { %v1827_v3 = vpack.c.bf16 %v48_v1, %v47_v0  ;;  %vm1973_vm1 = vmpackc.low %vm68_vm0, %vm68_vm0  ;;  %v50_v5 = vld [vmem:[%s2393_s1 + $0x18] sm:$0xff]  ;;  %v15_v6 = vld [vmem:[%s2392_s0] sm:$0xff] }
   0x3   :  { %v1833_v7 = vpack.c.bf16 %v50_v5, %v49_v2  ;;  %1667 = vmatprep.mubr.msk.f32.mxu0 %vm68_vm0, %v15_v6  ;;  %v51_v8 = vld [vmem:[%s2394_s2] sm:$0xff]  ;;  %v52_v9 = vld [vmem:[%s2394_s2 + $0x8] sm:$0xff] }
   0x4   :  { %1829 = vmatprep.subr.msk.bf16.mxu0 %vm1973_vm1, %v1827_v3  ;;  %v1839_v10 = vpack.c.bf16 %v52_v9, %v51_v8 }
   0x5   :  { %1832 = vmatpush3.bf16.xpose.msk.msra.mxu0 %vm1973_vm1, %v1827_v3 }
   0x6   :  { %1835 = vmatprep.subr.msk.bf16.mxu0 %vm1973_vm1, %v1833_v7 }
   0xd   :  { %1838 = vmatpush3.bf16.xpose.msk.msra.mxu0 %vm1973_vm1, %v1833_v7 }
   0xe   :  { %8 = vsyncpa [#allocation3], 0  ;;  %1840 = vmatprep.subr.bf16.mxu1 %v1839_v10  ;;  %v16_v11 = vld [vmem:[%s2392_s0 + $0x8] sm:$0xff]  ;;  %v17_v12 = vld [vmem:[%s2392_s0 + $0x10] sm:$0xff]  ;;  %vm438_vm2 = vcmask 261120  }
   0xf   :  { %1842 = vmatpush3.bf16.msra.mxu1 %v1839_v10  ;;  %v18_v13 = vld [vmem:[%s2392_s0 + $0x18] sm:$0xff]  ;;  %v19_v14 = vld [vmem:[%s2392_s0 + $0x20] sm:$0xff]  ;;  %v20_v15 = vld [vmem:[%s2392_s0 + $0x28] sm:$0xff] }
  0x10   :  { %v21_v16 = vld [vmem:[%s2392_s0 + $0x30] sm:$0xff]  ;;  %v22_v17 = vld [vmem:[%s2392_s0 + $0x38] sm:$0xff]  ;;  %v23_v18 = vld [vmem:[%s2392_s0 + $0x40] sm:$0xff] }
  0x11   :  { %v24_v19 = vld [vmem:[%s2392_s0 + $0x48] sm:$0xff]  ;;  %v25_v20 = vld [vmem:[%s2392_s0 + $0x50] sm:$0xff]  ;;  %v26_v21 = vld [vmem:[%s2392_s0 + $0x58] sm:$0xff] }
  0x12   :  { %v27_v22 = vld [vmem:[%s2392_s0 + $0x60] sm:$0xff]  ;;  %v28_v23 = vld [vmem:[%s2392_s0 + $0x68] sm:$0xff]  ;;  %v29_v24 = vld [vmem:[%s2392_s0 + $0x70] sm:$0xff] }
  0x13   :  { %v30_v25 = vld [vmem:[%s2392_s0 + $0x78] sm:$0xff]  ;;  %v31_v26 = vld [vmem:[%s2392_s0 + $0x80] sm:$0xff]  ;;  %v32_v27 = vld [vmem:[%s2392_s0 + $0x88] sm:$0xff] }
  0x14   :  { %1668 = vmatmul.mubr.msk.f32.vlgmr.msra.gmra.mrb[0].mxu0 %vm68_vm0, %v16_v11  ;;  %v33_v28 = vld [vmem:[%s2392_s0 + $0x90] sm:$0xff]  ;;  %v34_v29 = vld [vmem:[%s2392_s0 + $0x98] sm:$0xff]  ;;  %v35_v30 = vld [vmem:[%s2392_s0 + $0xa0] sm:$0xff] }
  0x15   :  { %1670 = vmatprep.mubr.msk.f32.mxu0 %vm68_vm0, %v17_v12  ;;  %v36_v31 = vld [vmem:[%s2392_s0 + $0xa8] sm:$0xff]  ;;  %v37_v32 = vld [vmem:[%s2392_s0 + $0xb0] sm:$0xff]  ;;  %v38_v33 = vld [vmem:[%s2392_s0 + $0xb8] sm:$0xff] }
  0x16   :  { %v39_v34 = vld [vmem:[%s2392_s0 + $0xc0] sm:$0xff]  ;;  %v40_v35 = vld [vmem:[%s2392_s0 + $0xc8] sm:$0xff]  ;;  %v41_v36 = vld [vmem:[%s2392_s0 + $0xd0] sm:$0xff] }
  0x17   :  { %v42_v37 = vld [vmem:[%s2392_s0 + $0xd8] sm:$0xff]  ;;  %v43_v38 = vld [vmem:[%s2392_s0 + $0xe0] sm:$0xff]  ;;  %v44_v39 = vld [vmem:[%s2392_s0 + $0xe8] sm:$0xff] }
  0x18   :  { %1671 = vmatmul.mubr.msk.f32.gmra.mrb[2].mxu0 %vm68_vm0, %v18_v13  ;;  %v45_v40 = vld [vmem:[%s2392_s0 + $0xf0] sm:$0xff]  ;;  %v46_v41 = vld [vmem:[%s2392_s0 + $0xf8] sm:$0xff]  ;;  %v55_v45 = vld [vmem:[%s2394_s2 + $0x20] sm:$0xff] }
  0x19   :  { %1673 = vmatprep.mubr.msk.f32.mxu0 %vm68_vm0, %v19_v14  ;;  %v53_v42 = vld [vmem:[%s2394_s2 + $0x10] sm:$0xff]  ;;  %v54_v43 = vld [vmem:[%s2394_s2 + $0x18] sm:$0xff]  ;;  %v56_v46 = vld [vmem:[%s2394_s2 + $0x28] sm:$0xff] }
  0x1a   :  { %v1843_v44 = vpack.c.bf16 %v54_v43, %v53_v42  ;;  %v1847_v47 = vpack.c.bf16 %v56_v46, %v55_v45  ;;  %v2137_v48 = vld [vmem:[%s2394_s2 + $0x48] ss:$0 sm:$0xff]  ;;  %v57_v53 = vld [vmem:[%s2394_s2 + $0x30] sm:$0xff]  ;;  %v58_v54 = vld [vmem:[%s2394_s2 + $0x38] sm:$0xff] }
  0x1b   :  { %v1851_v60 = vpack.c.bf16 %v58_v54, %v57_v53 }
  0x1c   :  { %1674 = vmatmul.mubr.msk.f32.gmra.mrb[4].mxu0 %vm68_vm0, %v20_v15  ;;  %1844 = vmatprep.subr.bf16.mxu1 %v1843_v44 }
  0x1d   :  { %1676 = vmatprep.mubr.msk.f32.mxu0 %vm68_vm0, %v21_v16  ;;  %1846 = vmatpush3.bf16.msra.mxu1 %v1843_v44 }
  0x1e   :  { %1848 = vmatprep.subr.bf16.mxu1 %v1847_v47 }
  0x20   :  { %1677 = vmatmul.mubr.msk.f32.gmra.mrb[6].mxu0 %vm68_vm0, %v22_v17 }
  0x21   :  { %1679 = vmatprep.mubr.msk.f32.mxu0 %vm68_vm0, %v23_v18 }
  0x24   :  { %1680 = vmatmul.mubr.msk.f32.gmra.mrb[8].mxu0 %vm68_vm0, %v24_v19 }
  0x25   :  { %1682 = vmatprep.mubr.msk.f32.mxu0 %vm68_vm0, %v25_v20 }
  0x28   :  { %1683 = vmatmul.mubr.msk.f32.gmra.mrb[10].mxu0 %vm68_vm0, %v26_v21 }
  0x29   :  { %1685 = vmatprep.mubr.msk.f32.mxu0 %vm68_vm0, %v27_v22 }
  0x2c   :  { %1686 = vmatmul.mubr.msk.f32.gmra.mrb[12].mxu0 %vm68_vm0, %v28_v23 }
  0x2d   :  { %1688 = vmatprep.mubr.msk.f32.mxu0 %vm68_vm0, %v29_v24 }
  0x30   :  { %1689 = vmatmul.mubr.msk.f32.gmra.mrb[14].mxu0 %vm68_vm0, %v30_v25 }
  0x31   :  { %1691 = vmatprep.mubr.msk.f32.mxu0 %vm68_vm0, %v31_v26 }
  0x34   :  { %1692 = vmatmul.mubr.msk.f32.gmra.mrb[16].mxu0 %vm68_vm0, %v32_v27 }
  0x35   :  { %1694 = vmatprep.mubr.msk.f32.mxu0 %vm68_vm0, %v33_v28 }
  0x38   :  { %1695 = vmatmul.mubr.msk.f32.gmra.mrb[18].mxu0 %vm68_vm0, %v34_v29 }
  0x39   :  { %1697 = vmatprep.mubr.msk.f32.mxu0 %vm68_vm0, %v35_v30 }
  0x3c   :  { %1698 = vmatmul.mubr.msk.f32.gmra.mrb[20].mxu0 %vm68_vm0, %v36_v31 }
  0x3d   :  { %1700 = vmatprep.mubr.msk.f32.mxu0 %vm68_vm0, %v37_v32 }
  0x40   :  { %1701 = vmatmul.mubr.msk.f32.gmra.mrb[22].mxu0 %vm68_vm0, %v38_v33 }
  0x41   :  { %1703 = vmatprep.mubr.msk.f32.mxu0 %vm68_vm0, %v39_v34 }
  0x44   :  { %1704 = vmatmul.mubr.msk.f32.gmra.mrb[24].mxu0 %vm68_vm0, %v40_v35 }
  0x45   :  { %1706 = vmatprep.mubr.msk.f32.mxu0 %vm68_vm0, %v41_v36 }
  0x48   :  { %1707 = vmatmul.mubr.msk.f32.gmra.mrb[26].mxu0 %vm68_vm0, %v42_v37 }
  0x49   :  { %1709 = vmatprep.mubr.msk.f32.mxu0 %vm68_vm0, %v43_v38 }
  0x4c   :  { %1710 = vmatmul.mubr.msk.f32.gmra.mrb[28].mxu0 %vm68_vm0, %v44_v39 }
  0x4d   :  { %1712 = vmatprep.mubr.msk.f32.mxu0 %vm68_vm0, %v45_v40 }
  0x50   :  { %1713 = vmatmul.mubr.msk.f32.gmra.mrb[30].mxu0 %vm68_vm0, %v46_v41 }
  0xe7   :  { %v1669_v49 = vpop.f32.mrb[0].mxu0 }
  0xe8   :  { %v249_v50 = vadd.f32 %v1669_v49, %v2137_v48  ;;  %v243_v51 = vpop.f32.mrb[1].mxu0 }
  0xe9   :  { %v244_v52 = vadd.f32 %v2137_v48, %v243_v51 }
  0xea   :  { %v403_v57 = vmax.f32 %v249_v50, 0.0 }
  0xeb   :  { %v402_v55 = vmax.f32 %v244_v52, 0.0  ;;  %v1672_v56 = vpop.f32.mrb[2].mxu0 }
  0xec   :  { %v259_v58 = vadd.f32 %v1672_v56, %v2137_v48  ;;  %v253_v59 = vpop.f32.mrb[3].mxu0 }
  0xed   :  { %v254_v61 = vadd.f32 %v2137_v48, %v253_v59  ;;  %1723 = vmatprep.mubr.msk.f32.mxu1 %vm438_vm2, %v402_v55 }
  0xee   :  { %1724 = vmatmul.mubr.msk.f32.vlgmr.msra.gmra.mrb[0].mxu1 %vm438_vm2, %v403_v57  ;;  %v405_v0 = vmax.f32 %v259_v58, 0.0 }
  0xef   :  { %v404_v62 = vmax.f32 %v254_v61, 0.0  ;;  %v1675_v63 = vpop.f32.mrb[4].mxu0  ;;  %1850 = vmatpush3.bf16.msra.mxu1 %v1847_v47 }
  0xf0   :  { %v269_v1 = vadd.f32 %v1675_v63, %v2137_v48  ;;  %v263_v2 = vpop.f32.mrb[5].mxu0  ;;  %1852 = vmatprep.subr.bf16.mxu1 %v1851_v60 }
  0xf1   :  { %v264_v3 = vadd.f32 %v2137_v48, %v263_v2  ;;  %1726 = vmatprep.mubr.msk.f32.mxu1 %vm438_vm2, %v404_v62 }
  0xf2   :  { %1727 = vmatmul.mubr.msk.f32.gmra.mrb[2].mxu1 %vm438_vm2, %v405_v0  ;;  %v407_v7 = vmax.f32 %v269_v1, 0.0 }
  0xf3   :  { %v406_v5 = vmax.f32 %v264_v3, 0.0  ;;  %v1678_v6 = vpop.f32.mrb[6].mxu0  ;;  %1854 = vmatpush3.bf16.msra.mxu1 %v1851_v60 }
  0xf4   :  { %v279_v8 = vadd.f32 %v1678_v6, %v2137_v48  ;;  %v273_v9 = vpop.f32.mrb[7].mxu0 }
  0xf5   :  { %v274_v10 = vadd.f32 %v2137_v48, %v273_v9  ;;  %1729 = vmatprep.mubr.msk.f32.mxu1 %vm438_vm2, %v406_v5 }
  0xf6   :  { %1730 = vmatmul.mubr.msk.f32.gmra.mrb[4].mxu1 %vm438_vm2, %v407_v7  ;;  %v409_v13 = vmax.f32 %v279_v8, 0.0 }
  0xf7   :  { %v408_v11 = vmax.f32 %v274_v10, 0.0  ;;  %v1681_v12 = vpop.f32.mrb[8].mxu0 }
  0xf8   :  { %v289_v14 = vadd.f32 %v1681_v12, %v2137_v48  ;;  %v283_v15 = vpop.f32.mrb[9].mxu0 }
  0xf9   :  { %v284_v16 = vadd.f32 %v2137_v48, %v283_v15  ;;  %1732 = vmatprep.mubr.msk.f32.mxu1 %vm438_vm2, %v408_v11 }
  0xfa   :  { %1733 = vmatmul.mubr.msk.f32.gmra.mrb[6].mxu1 %vm438_vm2, %v409_v13  ;;  %v411_v19 = vmax.f32 %v289_v14, 0.0 }
  0xfb   :  { %v410_v17 = vmax.f32 %v284_v16, 0.0  ;;  %v1684_v18 = vpop.f32.mrb[10].mxu0 }
  0xfc   :  { %v299_v20 = vadd.f32 %v1684_v18, %v2137_v48  ;;  %v293_v21 = vpop.f32.mrb[11].mxu0 }
  0xfd   :  { %v294_v22 = vadd.f32 %v2137_v48, %v293_v21  ;;  %1735 = vmatprep.mubr.msk.f32.mxu1 %vm438_vm2, %v410_v17 }
  0xfe   :  { %1736 = vmatmul.mubr.msk.f32.gmra.mrb[8].mxu1 %vm438_vm2, %v411_v19  ;;  %v413_v25 = vmax.f32 %v299_v20, 0.0 }
  0xff   :  { %v412_v23 = vmax.f32 %v294_v22, 0.0  ;;  %v1687_v24 = vpop.f32.mrb[12].mxu0 }
 0x100   :  { %v309_v26 = vadd.f32 %v1687_v24, %v2137_v48  ;;  %v303_v27 = vpop.f32.mrb[13].mxu0 }
 0x101   :  { %v304_v28 = vadd.f32 %v2137_v48, %v303_v27  ;;  %1738 = vmatprep.mubr.msk.f32.mxu1 %vm438_vm2, %v412_v23  ;;  %v2212_v23 = vld [vmem:[%s2394_s2 + $0x49] ss:$0 sm:$0xff] }
 0x102   :  { %1739 = vmatmul.mubr.msk.f32.gmra.mrb[10].mxu1 %vm438_vm2, %v413_v25  ;;  %v415_v31 = vmax.f32 %v309_v26, 0.0 }
 0x103   :  { %v414_v29 = vmax.f32 %v304_v28, 0.0  ;;  %v1690_v30 = vpop.f32.mrb[14].mxu0 }
 0x104   :  { %v319_v32 = vadd.f32 %v1690_v30, %v2137_v48  ;;  %v313_v33 = vpop.f32.mrb[15].mxu0 }
 0x105   :  { %v314_v34 = vadd.f32 %v2137_v48, %v313_v33  ;;  %1741 = vmatprep.mubr.msk.f32.mxu1 %vm438_vm2, %v414_v29 }
 0x106   :  { %1742 = vmatmul.mubr.msk.f32.gmra.mrb[12].mxu1 %vm438_vm2, %v415_v31  ;;  %v417_v37 = vmax.f32 %v319_v32, 0.0 }
 0x107   :  { %v416_v35 = vmax.f32 %v314_v34, 0.0  ;;  %v1693_v36 = vpop.f32.mrb[16].mxu0 }
 0x108   :  { %v329_v38 = vadd.f32 %v1693_v36, %v2137_v48  ;;  %v323_v39 = vpop.f32.mrb[17].mxu0 }
 0x109   :  { %v324_v40 = vadd.f32 %v2137_v48, %v323_v39  ;;  %1744 = vmatprep.mubr.msk.f32.mxu1 %vm438_vm2, %v416_v35 }
 0x10a   :  { %1745 = vmatmul.mubr.msk.f32.gmra.mrb[14].mxu1 %vm438_vm2, %v417_v37  ;;  %v419_v43 = vmax.f32 %v329_v38, 0.0 }
 0x10b   :  { %v418_v41 = vmax.f32 %v324_v40, 0.0  ;;  %v1696_v42 = vpop.f32.mrb[18].mxu0 }
 0x10c   :  { %v339_v44 = vadd.f32 %v1696_v42, %v2137_v48  ;;  %v333_v45 = vpop.f32.mrb[19].mxu0 }
 0x10d   :  { %v334_v46 = vadd.f32 %v2137_v48, %v333_v45  ;;  %1747 = vmatprep.mubr.msk.f32.mxu1 %vm438_vm2, %v418_v41 }
 0x10e   :  { %v421_v47 = vmax.f32 %v339_v44, 0.0  ;;  %1748 = vmatmul.mubr.msk.f32.gmra.mrb[16].mxu1 %vm438_vm2, %v419_v43 }
 0x10f   :  { %v420_v49 = vmax.f32 %v334_v46, 0.0  ;;  %v1699_v50 = vpop.f32.mrb[20].mxu0 }
 0x110   :  { %v349_v51 = vadd.f32 %v1699_v50, %v2137_v48  ;;  %v343_v52 = vpop.f32.mrb[21].mxu0 }
 0x111   :  { %1750 = vmatprep.mubr.msk.f32.mxu1 %vm438_vm2, %v420_v49  ;;  %v344_v53 = vadd.f32 %v2137_v48, %v343_v52 }
 0x112   :  { %v423_v54 = vmax.f32 %v349_v51, 0.0  ;;  %1751 = vmatmul.mubr.msk.f32.gmra.mrb[18].mxu1 %vm438_vm2, %v421_v47 }
 0x113   :  { %v422_v55 = vmax.f32 %v344_v53, 0.0  ;;  %v1702_v56 = vpop.f32.mrb[22].mxu0 }
 0x114   :  { %v359_v57 = vadd.f32 %v1702_v56, %v2137_v48  ;;  %v353_v58 = vpop.f32.mrb[23].mxu0 }
 0x115   :  { %1753 = vmatprep.mubr.msk.f32.mxu1 %vm438_vm2, %v422_v55  ;;  %v354_v59 = vadd.f32 %v2137_v48, %v353_v58 }
 0x116   :  { %1754 = vmatmul.mubr.msk.f32.gmra.mrb[20].mxu1 %vm438_vm2, %v423_v54  ;;  %v425_v60 = vmax.f32 %v359_v57, 0.0 }
 0x117   :  { %v424_v61 = vmax.f32 %v354_v59, 0.0  ;;  %v1705_v62 = vpop.f32.mrb[24].mxu0 }
 0x118   :  { %v369_v63 = vadd.f32 %v1705_v62, %v2137_v48  ;;  %v363_v0 = vpop.f32.mrb[25].mxu0 }
 0x119   :  { %1756 = vmatprep.mubr.msk.f32.mxu1 %vm438_vm2, %v424_v61  ;;  %v364_v1 = vadd.f32 %v2137_v48, %v363_v0 }
 0x11a   :  { %1757 = vmatmul.mubr.msk.f32.gmra.mrb[22].mxu1 %vm438_vm2, %v425_v60  ;;  %v427_v2 = vmax.f32 %v369_v63, 0.0 }
 0x11b   :  { %v426_v3 = vmax.f32 %v364_v1, 0.0  ;;  %v1708_v5 = vpop.f32.mrb[26].mxu0 }
 0x11c   :  { %v379_v6 = vadd.f32 %v1708_v5, %v2137_v48  ;;  %v373_v7 = vpop.f32.mrb[27].mxu0 }
 0x11d   :  { %1759 = vmatprep.mubr.msk.f32.mxu1 %vm438_vm2, %v426_v3  ;;  %v374_v8 = vadd.f32 %v2137_v48, %v373_v7 }
 0x11e   :  { %1760 = vmatmul.mubr.msk.f32.gmra.mrb[24].mxu1 %vm438_vm2, %v427_v2  ;;  %v429_v9 = vmax.f32 %v379_v6, 0.0 }
 0x11f   :  { %v428_v10 = vmax.f32 %v374_v8, 0.0  ;;  %v1711_v11 = vpop.f32.mrb[28].mxu0 }
 0x120   :  { %v389_v12 = vadd.f32 %v1711_v11, %v2137_v48  ;;  %v383_v13 = vpop.f32.mrb[29].mxu0 }
 0x121   :  { %1762 = vmatprep.mubr.msk.f32.mxu1 %vm438_vm2, %v428_v10  ;;  %v384_v14 = vadd.f32 %v2137_v48, %v383_v13 }
 0x122   :  { %1763 = vmatmul.mubr.msk.f32.gmra.mrb[26].mxu1 %vm438_vm2, %v429_v9  ;;  %v431_v15 = vmax.f32 %v389_v12, 0.0 }
 0x123   :  { %v430_v16 = vmax.f32 %v384_v14, 0.0  ;;  %v1714_v17 = vpop.f32.mrb[30].mxu0 }
 0x124   :  { %v399_v18 = vadd.f32 %v1714_v17, %v2137_v48  ;;  %v393_v19 = vpop.f32.mrb[31].mxu0 }
 0x125   :  { %1765 = vmatprep.mubr.msk.f32.mxu1 %vm438_vm2, %v430_v16  ;;  %v394_v20 = vadd.f32 %v2137_v48, %v393_v19 }
 0x126   :  { %1766 = vmatmul.mubr.msk.f32.gmra.mrb[28].mxu1 %vm438_vm2, %v431_v15  ;;  %v433_v21 = vmax.f32 %v399_v18, 0.0 }
 0x127   :  { %v432_v22 = vmax.f32 %v394_v20, 0.0 }
 0x129   :  { %1768 = vmatprep.mubr.msk.f32.mxu1 %vm438_vm2, %v432_v22 }
 0x12a   :  { %1769 = vmatmul.mubr.msk.f32.gmra.mrb[30].mxu1 %vm438_vm2, %v433_v21 }
 0x1c1   :  { %v1725_v24 = vpop.f32.mrb[0].mxu1 }
 0x1c2   :  { %v607_v25 = vadd.f32 %v1725_v24, %v2212_v23  ;;  %v601_v26 = vpop.f32.mrb[1].mxu1 }
 0x1c3   :  { %v602_v27 = vadd.f32 %v2212_v23, %v601_v26 }
 0x1c4   :  { %v761_v29 = vmax.f32 %v607_v25, 0.0 }
 0x1c5   :  { %v760_v48 = vmax.f32 %v602_v27, 0.0  ;;  %v1728_v28 = vpop.f32.mrb[2].mxu1 }
 0x1c6   :  { %v617_v30 = vadd.f32 %v1728_v28, %v2212_v23  ;;  %v611_v31 = vpop.f32.mrb[3].mxu1 }
 0x1c7   :  { %v612_v32 = vadd.f32 %v2212_v23, %v611_v31  ;;  %1779 = vmatprep.mubr.msk.f32.mxu1 %vm438_vm2, %v760_v48 }
 0x1c8   :  { %1780 = vmatmul.mubr.msk.f32.vlgmr.msra.gmra.mrb[32].mxu1 %vm438_vm2, %v761_v29  ;;  %v763_v35 = vmax.f32 %v617_v30, 0.0 }
 0x1c9   :  { %v762_v33 = vmax.f32 %v612_v32, 0.0  ;;  %v1731_v34 = vpop.f32.mrb[4].mxu1 }
 0x1ca   :  { %v627_v36 = vadd.f32 %v1731_v34, %v2212_v23  ;;  %v621_v37 = vpop.f32.mrb[5].mxu1 }
 0x1cb   :  { %v622_v38 = vadd.f32 %v2212_v23, %v621_v37  ;;  %1782 = vmatprep.mubr.msk.f32.mxu1 %vm438_vm2, %v762_v33 }
 0x1cc   :  { %1783 = vmatmul.mubr.msk.f32.gmra.mrb[34].mxu1 %vm438_vm2, %v763_v35  ;;  %v765_v41 = vmax.f32 %v627_v36, 0.0 }
 0x1cd   :  { %v764_v39 = vmax.f32 %v622_v38, 0.0  ;;  %v1734_v40 = vpop.f32.mrb[6].mxu1 }
 0x1ce   :  { %v637_v42 = vadd.f32 %v1734_v40, %v2212_v23  ;;  %v631_v43 = vpop.f32.mrb[7].mxu1 }
 0x1cf   :  { %v632_v44 = vadd.f32 %v2212_v23, %v631_v43  ;;  %1785 = vmatprep.mubr.msk.f32.mxu1 %vm438_vm2, %v764_v39 }
 0x1d0   :  { %1786 = vmatmul.mubr.msk.f32.gmra.mrb[36].mxu1 %vm438_vm2, %v765_v41  ;;  %v767_v47 = vmax.f32 %v637_v42, 0.0 }
 0x1d1   :  { %v766_v45 = vmax.f32 %v632_v44, 0.0  ;;  %v1737_v46 = vpop.f32.mrb[8].mxu1 }
 0x1d2   :  { %v647_v49 = vadd.f32 %v1737_v46, %v2212_v23  ;;  %v641_v50 = vpop.f32.mrb[9].mxu1 }
 0x1d3   :  { %v642_v51 = vadd.f32 %v2212_v23, %v641_v50  ;;  %1788 = vmatprep.mubr.msk.f32.mxu1 %vm438_vm2, %v766_v45 }
 0x1d4   :  { %1789 = vmatmul.mubr.msk.f32.gmra.mrb[38].mxu1 %vm438_vm2, %v767_v47  ;;  %v769_v54 = vmax.f32 %v647_v49, 0.0 }
 0x1d5   :  { %v768_v52 = vmax.f32 %v642_v51, 0.0  ;;  %v1740_v53 = vpop.f32.mrb[10].mxu1 }
 0x1d6   :  { %v657_v55 = vadd.f32 %v1740_v53, %v2212_v23  ;;  %v651_v56 = vpop.f32.mrb[11].mxu1 }
 0x1d7   :  { %v652_v57 = vadd.f32 %v2212_v23, %v651_v56  ;;  %1791 = vmatprep.mubr.msk.f32.mxu1 %vm438_vm2, %v768_v52 }
 0x1d8   :  { %1792 = vmatmul.mubr.msk.f32.gmra.mrb[40].mxu1 %vm438_vm2, %v769_v54  ;;  %v771_v60 = vmax.f32 %v657_v55, 0.0 }
 0x1d9   :  { %v770_v58 = vmax.f32 %v652_v57, 0.0  ;;  %v1743_v59 = vpop.f32.mrb[12].mxu1 }
 0x1da   :  { %v667_v61 = vadd.f32 %v1743_v59, %v2212_v23  ;;  %v661_v62 = vpop.f32.mrb[13].mxu1  ;;  %v1939_v59 = vmov 0  }
 0x1db   :  { %v662_v63 = vadd.f32 %v2212_v23, %v661_v62  ;;  %1794 = vmatprep.mubr.msk.f32.mxu1 %vm438_vm2, %v770_v58  ;;  %v2281_v58 = vld [vmem:[%s2394_s2 + $0x40] sm:$0x1]  ;;  %1906 = vset.pattern.permute.xlu0 %v1939_v59 }
 0x1dc   :  { %1795 = vmatmul.mubr.msk.f32.gmra.mrb[42].mxu1 %vm438_vm2, %v771_v60  ;;  %v773_v2 = vmax.f32 %v667_v61, 0.0  ;;  %1657 = vmatprep.mubr.msk.f32.mxu0 %vm68_vm0, %v2281_v58  ;;  %v2291_v60 = vld [vmem:[%s2394_s2 + $0x4a] ss:$0 sm:$0xff] }
 0x1dd   :  { %v772_v0 = vmax.f32 %v662_v63, 0.0  ;;  %v1746_v1 = vpop.f32.mrb[14].mxu1 }
 0x1de   :  { %v677_v3 = vadd.f32 %v1746_v1, %v2212_v23  ;;  %v671_v5 = vpop.f32.mrb[15].mxu1 }
 0x1df   :  { %v672_v6 = vadd.f32 %v2212_v23, %v671_v5  ;;  %1797 = vmatprep.mubr.msk.f32.mxu1 %vm438_vm2, %v772_v0 }
 0x1e0   :  { %1798 = vmatmul.mubr.msk.f32.gmra.mrb[44].mxu1 %vm438_vm2, %v773_v2  ;;  %v775_v9 = vmax.f32 %v677_v3, 0.0 }
 0x1e1   :  { %v774_v7 = vmax.f32 %v672_v6, 0.0  ;;  %v1749_v8 = vpop.f32.mrb[16].mxu1 }
 0x1e2   :  { %v687_v10 = vadd.f32 %v1749_v8, %v2212_v23  ;;  %v681_v11 = vpop.f32.mrb[17].mxu1 }
 0x1e3   :  { %v682_v12 = vadd.f32 %v2212_v23, %v681_v11  ;;  %1800 = vmatprep.mubr.msk.f32.mxu1 %vm438_vm2, %v774_v7 }
 0x1e4   :  { %1801 = vmatmul.mubr.msk.f32.gmra.mrb[46].mxu1 %vm438_vm2, %v775_v9  ;;  %v777_v15 = vmax.f32 %v687_v10, 0.0 }
 0x1e5   :  { %v776_v13 = vmax.f32 %v682_v12, 0.0  ;;  %v1752_v14 = vpop.f32.mrb[18].mxu1 }
 0x1e6   :  { %v697_v16 = vadd.f32 %v1752_v14, %v2212_v23  ;;  %v691_v17 = vpop.f32.mrb[19].mxu1 }
 0x1e7   :  { %v692_v18 = vadd.f32 %v2212_v23, %v691_v17  ;;  %1803 = vmatprep.mubr.msk.f32.mxu1 %vm438_vm2, %v776_v13 }
 0x1e8   :  { %v779_v19 = vmax.f32 %v697_v16, 0.0  ;;  %1804 = vmatmul.mubr.msk.f32.gmra.mrb[48].mxu1 %vm438_vm2, %v777_v15 }
 0x1e9   :  { %v778_v20 = vmax.f32 %v692_v18, 0.0  ;;  %v1755_v21 = vpop.f32.mrb[20].mxu1 }
 0x1ea   :  { %v707_v22 = vadd.f32 %v1755_v21, %v2212_v23  ;;  %v701_v24 = vpop.f32.mrb[21].mxu1 }
 0x1eb   :  { %1806 = vmatprep.mubr.msk.f32.mxu1 %vm438_vm2, %v778_v20  ;;  %v702_v25 = vadd.f32 %v2212_v23, %v701_v24 }
 0x1ec   :  { %v781_v26 = vmax.f32 %v707_v22, 0.0  ;;  %1807 = vmatmul.mubr.msk.f32.gmra.mrb[50].mxu1 %vm438_vm2, %v779_v19 }
 0x1ed   :  { %v780_v27 = vmax.f32 %v702_v25, 0.0  ;;  %v1758_v48 = vpop.f32.mrb[22].mxu1 }
 0x1ee   :  { %v717_v28 = vadd.f32 %v1758_v48, %v2212_v23  ;;  %v711_v29 = vpop.f32.mrb[23].mxu1 }
 0x1ef   :  { %1809 = vmatprep.mubr.msk.f32.mxu1 %vm438_vm2, %v780_v27  ;;  %v712_v30 = vadd.f32 %v2212_v23, %v711_v29 }
 0x1f0   :  { %1810 = vmatmul.mubr.msk.f32.gmra.mrb[52].mxu1 %vm438_vm2, %v781_v26  ;;  %v783_v31 = vmax.f32 %v717_v28, 0.0 }
 0x1f1   :  { %v782_v32 = vmax.f32 %v712_v30, 0.0  ;;  %v1761_v33 = vpop.f32.mrb[24].mxu1 }
 0x1f2   :  { %v727_v34 = vadd.f32 %v1761_v33, %v2212_v23  ;;  %v721_v35 = vpop.f32.mrb[25].mxu1 }
 0x1f3   :  { %1812 = vmatprep.mubr.msk.f32.mxu1 %vm438_vm2, %v782_v32  ;;  %v722_v36 = vadd.f32 %v2212_v23, %v721_v35 }
 0x1f4   :  { %1813 = vmatmul.mubr.msk.f32.gmra.mrb[54].mxu1 %vm438_vm2, %v783_v31  ;;  %v785_v37 = vmax.f32 %v727_v34, 0.0 }
 0x1f5   :  { %v784_v38 = vmax.f32 %v722_v36, 0.0  ;;  %v1764_v39 = vpop.f32.mrb[26].mxu1 }
 0x1f6   :  { %v737_v40 = vadd.f32 %v1764_v39, %v2212_v23  ;;  %v731_v41 = vpop.f32.mrb[27].mxu1 }
 0x1f7   :  { %1815 = vmatprep.mubr.msk.f32.mxu1 %vm438_vm2, %v784_v38  ;;  %v732_v42 = vadd.f32 %v2212_v23, %v731_v41 }
 0x1f8   :  { %1816 = vmatmul.mubr.msk.f32.gmra.mrb[56].mxu1 %vm438_vm2, %v785_v37  ;;  %v787_v43 = vmax.f32 %v737_v40, 0.0 }
 0x1f9   :  { %v786_v44 = vmax.f32 %v732_v42, 0.0  ;;  %v1767_v45 = vpop.f32.mrb[28].mxu1 }
 0x1fa   :  { %v747_v46 = vadd.f32 %v1767_v45, %v2212_v23  ;;  %v741_v47 = vpop.f32.mrb[29].mxu1 }
 0x1fb   :  { %1818 = vmatprep.mubr.msk.f32.mxu1 %vm438_vm2, %v786_v44  ;;  %v742_v49 = vadd.f32 %v2212_v23, %v741_v47 }
 0x1fc   :  { %1819 = vmatmul.mubr.msk.f32.gmra.mrb[58].mxu1 %vm438_vm2, %v787_v43  ;;  %v789_v50 = vmax.f32 %v747_v46, 0.0 }
 0x1fd   :  { %v788_v51 = vmax.f32 %v742_v49, 0.0  ;;  %v1770_v52 = vpop.f32.mrb[30].mxu1 }
 0x1fe   :  { %v757_v53 = vadd.f32 %v1770_v52, %v2212_v23  ;;  %v751_v54 = vpop.f32.mrb[31].mxu1 }
 0x1ff   :  { %1821 = vmatprep.mubr.msk.f32.mxu1 %vm438_vm2, %v788_v51  ;;  %v752_v55 = vadd.f32 %v2212_v23, %v751_v54  ;;  %v63_v23 = vld [vmem:[%s2394_s2 + $0x50] sm:$0x1]  ;;  %s1941_s2 = smov [#allocation2]  }
 0x200   :  { %1822 = vmatmul.mubr.msk.f32.gmra.mrb[60].mxu1 %vm438_vm2, %v789_v50  ;;  %v791_v56 = vmax.f32 %v757_v53, 0.0  ;;  %1151 = vperm.xlu0 %1906, %v63_v23   ;;  %s1373_s24 = sshll.u32 %s1941_s2, 4  ;;  %s1374_s24 = int_to_ptr.vmem [resolvable:$true] %s1373_s24 }
 0x201   :  { %v790_v57 = vmax.f32 %v752_v55, 0.0  ;;  %s1915_s25 = scalar_lea.vmem %s1374_s24, 32  ;;  %p1920_p1 = scmp.lt.s32.totalorder %s1374_s24, %s1374_s24 }
 0x202   :  { %p1916_p0 = scmp.ne.s32.totalorder %s1374_s24, %s1915_s25  ;;  %p1921_p2 = scmp.lt.s32.totalorder %s1915_s25, %s1915_s25 }
 0x203   :  { %1824 = vmatprep.mubr.msk.f32.mxu1 %vm438_vm2, %v790_v57 }
 0x204   :  { %1825 = vmatmul.mubr.msk.f32.gmra.mrb[62].mxu1 %vm438_vm2, %v791_v56  ;;  %p1922_p3 = por %p1921_p2, %p1920_p1 }
 0x206   :  { %p1923_p4 = pnand %p1922_p3, %p1916_p0 }
 0x29b   :  { %v1781_v61 = vpop.f32.mrb[32].mxu1 }
 0x29c   :  { %v964_v62 = vadd.f32 %v1781_v61, %v2291_v60  ;;  %v958_v63 = vpop.f32.mrb[33].mxu1 }
 0x29d   :  { %v959_v0 = vadd.f32 %v2291_v60, %v958_v63 }
 0x29e   :  { %v1118_v1 = vmax.f32 %v964_v62, 0.0 }
 0x29f   :  { %v1117_v2 = vmax.f32 %v959_v0, 0.0  ;;  %v1784_v3 = vpop.f32.mrb[34].mxu1 }
 0x2a0   :  { %v974_v5 = vadd.f32 %v1784_v3, %v2291_v60  ;;  %v968_v6 = vpop.f32.mrb[35].mxu1 }
 0x2a1   :  { %v1858_v7 = vpack.c.bf16 %v1118_v1, %v1117_v2  ;;  %v969_v8 = vadd.f32 %v2291_v60, %v968_v6 }
 0x2a2   :  { %v1120_v9 = vmax.f32 %v974_v5, 0.0 }
 0x2a3   :  { %v1119_v10 = vmax.f32 %v969_v8, 0.0  ;;  %v1787_v11 = vpop.f32.mrb[36].mxu1 }
 0x2a4   :  { %v984_v12 = vadd.f32 %v1787_v11, %v2291_v60  ;;  %v978_v13 = vpop.f32.mrb[37].mxu1 }
 0x2a5   :  { %v2298_v14 = vpack.c.bf16 %v1120_v9, %v1119_v10  ;;  %v979_v15 = vadd.f32 %v2291_v60, %v978_v13 }
 0x2a6   :  { %v1122_v16 = vmax.f32 %v984_v12, 0.0 }
 0x2a7   :  { %v1121_v17 = vmax.f32 %v979_v15, 0.0  ;;  %v1790_v18 = vpop.f32.mrb[38].mxu1 }
 0x2a8   :  { %v994_v19 = vadd.f32 %v1790_v18, %v2291_v60  ;;  %v988_v20 = vpop.f32.mrb[39].mxu1 }
 0x2a9   :  { %v2302_v21 = vpack.c.bf16 %v1122_v16, %v1121_v17  ;;  %v989_v22 = vadd.f32 %v2291_v60, %v988_v20 }
 0x2aa   :  { %v1124_v24 = vmax.f32 %v994_v19, 0.0 }
 0x2ab   :  { %v1123_v25 = vmax.f32 %v989_v22, 0.0  ;;  %v1793_v26 = vpop.f32.mrb[40].mxu1 }
 0x2ac   :  { %v1004_v27 = vadd.f32 %v1793_v26, %v2291_v60  ;;  %v998_v48 = vpop.f32.mrb[41].mxu1 }
 0x2ad   :  { %v2306_v28 = vpack.c.bf16 %v1124_v24, %v1123_v25  ;;  %v999_v29 = vadd.f32 %v2291_v60, %v998_v48 }
 0x2ae   :  { %v1126_v30 = vmax.f32 %v1004_v27, 0.0 }
 0x2af   :  { %v1125_v31 = vmax.f32 %v999_v29, 0.0  ;;  %v1796_v32 = vpop.f32.mrb[42].mxu1 }
 0x2b0   :  { %v1014_v33 = vadd.f32 %v1796_v32, %v2291_v60  ;;  %v1008_v34 = vpop.f32.mrb[43].mxu1 }
 0x2b1   :  { %v2310_v35 = vpack.c.bf16 %v1126_v30, %v1125_v31  ;;  %v1009_v36 = vadd.f32 %v2291_v60, %v1008_v34 }
 0x2b2   :  { %v1128_v37 = vmax.f32 %v1014_v33, 0.0 }
 0x2b3   :  { %v1127_v38 = vmax.f32 %v1009_v36, 0.0  ;;  %v1799_v39 = vpop.f32.mrb[44].mxu1 }
 0x2b4   :  { %v1024_v40 = vadd.f32 %v1799_v39, %v2291_v60  ;;  %v1018_v41 = vpop.f32.mrb[45].mxu1 }
 0x2b5   :  { %v2314_v42 = vpack.c.bf16 %v1128_v37, %v1127_v38  ;;  %v1019_v43 = vadd.f32 %v2291_v60, %v1018_v41 }
 0x2b6   :  { %v1130_v44 = vmax.f32 %v1024_v40, 0.0 }
 0x2b7   :  { %v1129_v45 = vmax.f32 %v1019_v43, 0.0  ;;  %v1802_v46 = vpop.f32.mrb[46].mxu1 }
 0x2b8   :  { %v1034_v47 = vadd.f32 %v1802_v46, %v2291_v60  ;;  %v1028_v49 = vpop.f32.mrb[47].mxu1 }
 0x2b9   :  { %v2318_v50 = vpack.c.bf16 %v1130_v44, %v1129_v45  ;;  %v1029_v51 = vadd.f32 %v2291_v60, %v1028_v49 }
 0x2ba   :  { %v1132_v52 = vmax.f32 %v1034_v47, 0.0 }
 0x2bb   :  { %v1131_v53 = vmax.f32 %v1029_v51, 0.0  ;;  %v1805_v54 = vpop.f32.mrb[48].mxu1 }
 0x2bc   :  { %v1044_v55 = vadd.f32 %v1805_v54, %v2291_v60  ;;  %v1038_v56 = vpop.f32.mrb[49].mxu1 }
 0x2bd   :  { %v2322_v57 = vpack.c.bf16 %v1132_v52, %v1131_v53  ;;  %v1039_v23 = vadd.f32 %v2291_v60, %v1038_v56 }
 0x2be   :  { %v1134_v59 = vmax.f32 %v1044_v55, 0.0 }
 0x2bf   :  { %v1133_v61 = vmax.f32 %v1039_v23, 0.0  ;;  %v1808_v62 = vpop.f32.mrb[50].mxu1 }
 0x2c0   :  { %v1054_v63 = vadd.f32 %v1808_v62, %v2291_v60  ;;  %v1048_v0 = vpop.f32.mrb[51].mxu1 }
 0x2c1   :  { %v1855_v1 = vpack.c.bf16 %v1134_v59, %v1133_v61  ;;  %v1049_v2 = vadd.f32 %v2291_v60, %v1048_v0 }
 0x2c2   :  { %v1136_v3 = vmax.f32 %v1054_v63, 0.0 }
 0x2c3   :  { %v1135_v5 = vmax.f32 %v1049_v2, 0.0  ;;  %1857 = vmatprep.subr.msk.bf16.mxu0 %vm1973_vm1, %v1855_v1  ;;  %v1811_v6 = vpop.f32.mrb[52].mxu1  ;;  %v1350_v1 = vlaneseq }
 0x2c4   :  { %1860 = vmatpush3.bf16.xpose.msk.msra.mxu0 %vm1973_vm1, %v1858_v7  ;;  %v1064_v8 = vadd.f32 %v1811_v6, %v2291_v60  ;;  %v1058_v9 = vpop.f32.mrb[53].mxu1 }
 0x2c5   :  { %v1861_v10 = vpack.c.bf16 %v1136_v3, %v1135_v5  ;;  %v1059_v11 = vadd.f32 %v2291_v60, %v1058_v9  ;;  %v1351_v3 = vshrl.u32 %v1350_v1, 7  ;;  %vm1364_vm5 = vcmp.lt.s32.totalorder %v1350_v1, 256 }
 0x2c6   :  { %v1138_v12 = vmax.f32 %v1064_v8, 0.0 }
 0x2c7   :  { %v1137_v13 = vmax.f32 %v1059_v11, 0.0  ;;  %1863 = vmatprep.subr.msk.bf16.mxu0 %vm1973_vm1, %v1861_v10  ;;  %v1814_v15 = vpop.f32.mrb[54].mxu1 }
 0x2c8   :  { %v1074_v16 = vadd.f32 %v1814_v15, %v2291_v60  ;;  %v1068_v17 = vpop.f32.mrb[55].mxu1 }
 0x2c9   :  { %v1867_v18 = vpack.c.bf16 %v1138_v12, %v1137_v13  ;;  %v1069_v19 = vadd.f32 %v2291_v60, %v1068_v17 }
 0x2ca   :  { %v1140_v20 = vmax.f32 %v1074_v16, 0.0 }
 0x2cb   :  { %v1139_v7 = vmax.f32 %v1069_v19, 0.0  ;;  %v1817_v22 = vpop.f32.mrb[56].mxu1 }
 0x2cc   :  { %1866 = vmatpush3.bf16.xpose.msk.msra.mxu0 %vm1973_vm1, %v2298_v14  ;;  %v1084_v24 = vadd.f32 %v1817_v22, %v2291_v60  ;;  %v1078_v25 = vpop.f32.mrb[57].mxu1 }
 0x2cd   :  { %1869 = vmatprep.subr.msk.bf16.mxu0 %vm1973_vm1, %v1867_v18  ;;  %v1873_v26 = vpack.c.bf16 %v1140_v20, %v1139_v7  ;;  %v1079_v27 = vadd.f32 %v2291_v60, %v1078_v25 }
 0x2ce   :  { %v1142_v48 = vmax.f32 %v1084_v24, 0.0 }
 0x2cf   :  { %v1141_v29 = vmax.f32 %v1079_v27, 0.0  ;;  %v1820_v30 = vpop.f32.mrb[58].mxu1 }
 0x2d0   :  { %v1094_v31 = vadd.f32 %v1820_v30, %v2291_v60  ;;  %v1088_v32 = vpop.f32.mrb[59].mxu1 }
 0x2d1   :  { %v1879_v33 = vpack.c.bf16 %v1142_v48, %v1141_v29  ;;  %v1089_v34 = vadd.f32 %v2291_v60, %v1088_v32 }
 0x2d2   :  { %v1144_v36 = vmax.f32 %v1094_v31, 0.0 }
 0x2d3   :  { %v1143_v14 = vmax.f32 %v1089_v34, 0.0  ;;  %v1823_v37 = vpop.f32.mrb[60].mxu1 }
 0x2d4   :  { %1872 = vmatpush3.bf16.xpose.msk.msra.mxu0 %vm1973_vm1, %v2302_v21  ;;  %v1104_v38 = vadd.f32 %v1823_v37, %v2291_v60  ;;  %v1098_v39 = vpop.f32.mrb[61].mxu1 }
 0x2d5   :  { %1875 = vmatprep.subr.msk.bf16.mxu0 %vm1973_vm1, %v1873_v26  ;;  %v1885_v40 = vpack.c.bf16 %v1144_v36, %v1143_v14  ;;  %v1099_v41 = vadd.f32 %v2291_v60, %v1098_v39 }
 0x2d6   :  { %v1146_v43 = vmax.f32 %v1104_v38, 0.0 }
 0x2d7   :  { %v1145_v44 = vmax.f32 %v1099_v41, 0.0  ;;  %v1826_v45 = vpop.f32.mrb[62].mxu1 }
 0x2d8   :  { %v1114_v46 = vadd.f32 %v1826_v45, %v2291_v60  ;;  %v1108_v47 = vpop.f32.mrb[63].mxu1 }
 0x2d9   :  { %v1891_v49 = vpack.c.bf16 %v1146_v43, %v1145_v44  ;;  %v1109_v51 = vadd.f32 %v2291_v60, %v1108_v47  ;;  %v1152_v60 = vpop.permute.xlu0 %1151 }
 0x2da   :  { %v1148_v52 = vmax.f32 %v1114_v46, 0.0 }
 0x2db   :  { %v1147_v21 = vmax.f32 %v1109_v51, 0.0 }
 0x2dc   :  { %1878 = vmatpush3.bf16.xpose.msk.msra.mxu0 %vm1973_vm1, %v2306_v28 }
 0x2dd   :  { %1881 = vmatprep.subr.msk.bf16.mxu0 %vm1973_vm1, %v1879_v33  ;;  %v1897_v53 = vpack.c.bf16 %v1148_v52, %v1147_v21 }
 0x2e4   :  { %1884 = vmatpush3.bf16.xpose.msk.msra.mxu0 %vm1973_vm1, %v2310_v35 }
 0x2e5   :  { %1887 = vmatprep.subr.msk.bf16.mxu0 %vm1973_vm1, %v1885_v40 }
 0x2ec   :  { %1890 = vmatpush3.bf16.xpose.msk.msra.mxu0 %vm1973_vm1, %v2314_v42 }
 0x2ed   :  { %1893 = vmatprep.subr.msk.bf16.mxu0 %vm1973_vm1, %v1891_v49 }
 0x2f4   :  { %1896 = vmatpush3.bf16.xpose.msk.msra.mxu0 %vm1973_vm1, %v2318_v50 }
 0x2f5   :  { %1899 = vmatprep.subr.msk.bf16.mxu0 %vm1973_vm1, %v1897_v53 }
 0x2fc   :  { %1902 = vmatpush3.bf16.xpose.msk.msra.mxu0 %vm1973_vm1, %v2322_v57 }
 0x303   :  { %1658 = vmatmul.mubr.msk.f32.vlgmr.msra.gmra.mrb[32].mxu0 %vm68_vm0, %v2281_v58  ;;  %v1940_v58 = vmov 1966171168  }
 0x304   :  { %v1348_v0 = vunpack.c.l.s4 %v1940_v58 }
 0x306   :  { %v1349_v2 = vunpack.c.0.s8 %v1348_v0 }
 0x308   :  { %v1352_v11 = vsub.s32 %v1349_v2, %v1351_v3 }
 0x3d6   :  { %v1319_v28 = vpop.f32.mrb[32].mxu0 }
 0x3d7   :  { %v1320_v35 = vadd.f32 %v1319_v28, %v1152_v60  ;;  %v1321_v42 = vpop.f32.mrb[33].mxu0 }
 0x3d8   :  { %v1322_v54 = vadd.f32 %v1321_v42, %v1152_v60 }
 0x3d9   :  { %v1324_v55 = vand.u32 2147483647, %v1320_v35  ;;  %vm1332_vm3 = vcmp.ge.f32.partialorder %v1320_v35, 0.0 }
 0x3da   :  { %v1325_v56 = vand.u32 2147483647, %v1322_v54  ;;  %vm1333_vm4 = vcmp.ge.f32.partialorder %v1322_v54, 0.0 }
 0x3db   :  { %v1326_v23 = vsub.f32 0.0, %v1324_v55 }
 0x3dc   :  { %v1327_v59 = vsub.f32 0.0, %v1325_v56 }
 0x3dd   :  { %v1328_v50 = vmul.f32 1.442695, %v1326_v23 }
 0x3de   :  { %v1330_v61 = vmul.f32 1.442695, %v1327_v59 }
 0x3df   :  { %1907 = vpow2.f32 %v1328_v50 }
 0x3e0   :  { %1909 = vpow2.f32 %v1330_v61 }
 0x3e9   :  { %v1908_v62 = vpop.eup %1907 }
 0x3ea   :  { %v1910_v63 = vpop.eup %1909  ;;  %v1334_v4 = vadd.f32 1.0, %v1908_v62 }
 0x3eb   :  { %v1335_v57 = vadd.f32 1.0, %v1910_v63 }
 0x3ec   :  { %1911 = vrcp.f32 %v1334_v4 }
 0x3ed   :  { %1913 = vrcp.f32 %v1335_v57 }
 0x3f6   :  { %v1912_v5 = vpop.eup %1911 }
 0x3f7   :  { %v1914_v6 = vpop.eup %1913  ;;  %v1340_v8 = vmul.f32 %v1912_v5, %v1908_v62 }
 0x3f8   :  { %v1341_v9 = vmul.f32 %v1914_v6, %v1910_v63 }
 0x3f9   :  { %v1342_v10 = vsel %vm1332_vm3, %v1912_v5, %v1340_v8 }
 0x3fa   :  { %v1343_v12 = vsel %vm1333_vm4, %v1914_v6, %v1341_v9 }
 0x3fb   :  { %v1346_v13 = vcombine.low %v1342_v10, %v1343_v12 }
 0x3fd   :  { %v1353_v15 = vrot.slane %v1346_v13, %v1352_v11 }
 0x3ff   :  { %v1360_v16 = vrot.slane %v1353_v15, %v1352_v11 }
 0x401   :  { %1366 = vst.msk [vmem:[#allocation2] sm:$0x3] %vm1364_vm5, %v1360_v16 }
 0x402   :  { %1926 = shalt.err (!%p1923_p4)
}
 0x403   :  { %s1927_s28 = scalar_lea.hbm %s2395_s3, 32 }
 0x404   :  { %p1928_p5 = scmp.ne.s32.totalorder %s2395_s3, %s1927_s28  ;;  %p1931_p6 = scmp.lt.u32.totalorder %s1927_s28, %s2395_s3 }
 0x406   :  { %p1933_p7 = pnand %p1931_p6, %p1928_p5 }
 0x408   :  { %1936 = shalt.err (!%p1933_p7)
}
 0x409   :  { %1376 = dma.vmem_to_hbm [thread:$0]  %s1374_s24, 32, %s2395_s3, [#allocation3]  }
 0x40a   :  { %1937 = dma.done.wait [#allocation3], 32  }
 0x40b   :  { %1938 = vsyncadd [#allocation3], 4294967264 }
 0x40c   :  { %1380 = vsyncpa [#allocation3], 1 }

</bundles_post_ra>
